<compile_context>
chip_gen: v6e
topology: v6e:2x2x1
jax: 0.10.0
libtpu: 0.0.40
codegen_flags: <defaults>
</compile_context>

<pallas_src>
import functools

import jax
import jax.numpy as jnp
from jax.experimental import pallas as pl
from jax.experimental.pallas import tpu as pltpu

HIDDEN = 256


def _round_up(x, m):
    return (x + m - 1) // m * m


def _actor_kernel(ma_ref, s_ref, w1_ref, b1_ref, w2_ref, b2_ref, w3_ref, b3_ref, o_ref):
    # Layer 1: bf16 MXU matmul with K = state_dim (unpadded), f32 accumulation.
    h = jnp.dot(s_ref[...].astype(jnp.bfloat16), w1_ref[...],
                preferred_element_type=jnp.float32)
    # Bias + ReLU in f32; store the hidden intermediate as bf16 (halves VMEM / vst traffic).
    h = jnp.maximum(h + b1_ref[...], 0.0).astype(jnp.bfloat16)
    # Layer 2.
    h = jnp.dot(h, w2_ref[...], preferred_element_type=jnp.float32)
    h = jnp.maximum(h + b2_ref[...], 0.0).astype(jnp.bfloat16)
    # Layer 3 + tanh (EUP) scaled by the runtime max_action; lane-dense (128) store.
    h = jnp.dot(h, w3_ref[...], preferred_element_type=jnp.float32)
    o_ref[...] = (ma_ref[...] * jnp.tanh(h + b3_ref[...])).astype(o_ref.dtype)


def _build_forward(S, H, A, A_pad, *, single_buffer_weights, core_parallel,
                   max_tile_b, unpad):
    """Build a jitted forward for fixed feature dims (batch specialization via jit)."""

    def const_spec(shape):
        idx = lambda i: (0,) * len(shape)
        if single_buffer_weights:
            # Constant index_map -> never re-DMA'd; single buffer saves VMEM.
            return pl.BlockSpec(shape, idx, pipeline_mode=pl.Buffered(1))
        return pl.BlockSpec(shape, idx)

    @jax.jit
    def fwd(state, ma, w1, b1, w2, b2, w3, b3):
        B = state.shape[0]
        b8 = _round_up(max(B, 1), 8)

        if core_parallel and b8 >= 16:
            # >= 2 equally sized steps so v7x can shard the batch across its 2 TCs.
            tile_b = min(max_tile_b, _round_up((b8 + 1) // 2, 8))
        else:
            # Single-TC chips (v5e/v6e): one big tile, no per-step overhead.
            tile_b = min(max_tile_b, b8)

        B_pad = _round_up(B, tile_b)
        grid_n = B_pad // tile_b

        state = state.astype(jnp.float32)
        if B_pad != B:
            state = jnp.zeros((B_pad, S), jnp.float32).at[:B, :].set(state)

        if core_parallel and grid_n > 1:
            semantics = (pltpu.CORE_PARALLEL,)
        elif grid_n > 1:
            semantics = ("parallel",)
        else:
            semantics = ("arbitrary",)

        # Advisory cost estimate so XLA can schedule/overlap this small kernel.
        flops = 2 * B_pad * (S * H + H * H + H * A_pad)
        bytes_accessed = (B_pad * S * 4 + B_pad * A_pad * 4
                          + (w1.size + w2.size + w3.size) * 2
                          + (b1.size + b2.size + b3.size + 1) * 4)
        cost = pl.CostEstimate(flops=flops, transcendentals=B_pad * A_pad,
                               bytes_accessed=bytes_accessed)

        out = pl.pallas_call(
            _actor_kernel,
            out_shape=jax.ShapeDtypeStruct((B_pad, A_pad), jnp.float32),
            grid_spec=pltpu.PrefetchScalarGridSpec(
                num_scalar_prefetch=0,
                grid=(grid_n,),
                in_specs=[
                    const_spec((1, 1)),                            # max_action
                    pl.BlockSpec((tile_b, S), lambda i: (i, 0)),   # state tile (unpadded K)
                    const_spec((S, H)),                            # w1 (resident)
                    const_spec((1, H)),                            # b1
                    const_spec((H, H)),                            # w2
                    const_spec((1, H)),                            # b2
                    const_spec((H, A_pad)),                        # w3 (lane-padded N)
                    const_spec((1, A_pad)),                        # b3 (lane-padded)
                ],
                out_specs=pl.BlockSpec((tile_b, A_pad), lambda i: (i, 0)),
            ),
            compiler_params=pltpu.CompilerParams(
                dimension_semantics=semantics,
                vmem_limit_bytes=32 * 1024 * 1024,
            ),
            cost_estimate=cost,
        )(ma, state, w1, b1, w2, b2, w3, b3)

        if unpad:
            return out[:B, :A]
        return out

    return fwd


class ActorKernel:
    """Actor forward pass with cached, pre-formatted parameters.

    params: dict with w1 (S,256), b1 (1,256), w2 (256,256), b2 (1,256),
            w3 (256,A), b3 (1,A)   [stored (in_features, out_features), i.e. x @ W + b]
    Set core_parallel=True on v7x to split the batch across its two TensorCores.
    Set unpad_output=False to receive the lane-padded (B_pad, 128k) buffer and
    skip the post-kernel slice copy.
    """

    def __init__(self, params, max_action, *, core_parallel=False,
                 max_tile_b=1024, unpad_output=True):
        w1 = jnp.asarray(params["w1"])
        S, H = w1.shape
        A = jnp.asarray(params["w3"]).shape[1]
        A_pad = _round_up(max(A, 1), 128)
        self.state_dim, self.hidden, self.action_dim, self.action_pad = S, H, A, A_pad

        # One-time weight formatting (hoisted out of the per-call path).
        self._w1 = w1.astype(jnp.bfloat16)
        self._b1 = jnp.asarray(params["b1"], jnp.float32).reshape(1, H)
        self._w2 = jnp.asarray(params["w2"], jnp.bfloat16)
        self._b2 = jnp.asarray(params["b2"], jnp.float32).reshape(1, H)
        self._w3 = jnp.zeros((H, A_pad), jnp.bfloat16).at[:, :A].set(
            jnp.asarray(params["w3"], jnp.bfloat16))
        self._b3 = jnp.zeros((1, A_pad), jnp.float32).at[:, :A].set(
            jnp.asarray(params["b3"], jnp.float32).reshape(1, A))
        self._ma = jnp.full((1, 1), max_action, jnp.float32)   # runtime operand

        self._build = functools.partial(
            _build_forward, S, H, A, A_pad,
            core_parallel=core_parallel, max_tile_b=max_tile_b, unpad=unpad_output)
        self._fwd = None  # resolved lazily (Buffered(1) first, then fallback)

    def __call__(self, state):
        args = (state, self._ma, self._w1, self._b1, self._w2, self._b2,
                self._w3, self._b3)
        if self._fwd is None:
            fwd = self._build(single_buffer_weights=True)
            try:
                out = fwd(*args)
            except Exception:
                # Installed JAX may reject pipeline_mode=pl.Buffered(1); fall back.
                fwd = self._build(single_buffer_weights=False)
                out = fwd(*args)
            self._fwd = fwd
            return out
        return self._fwd(*args)


def init_actor_params(key, state_dim, action_dim, hidden=HIDDEN):
    """Deterministic synthetic parameters (shapes match the nn.Linear layers)."""
    k1, k2, k3, k4, k5, k6 = jax.random.split(key, 6)
    s1 = 1.0 / jnp.sqrt(state_dim)
    s2 = 1.0 / jnp.sqrt(hidden)
    return {
        "w1": jax.random.uniform(k1, (state_dim, hidden), jnp.float32, -s1, s1),
        "b1": jax.random.uniform(k2, (1, hidden), jnp.float32, -s1, s1),
        "w2": jax.random.uniform(k3, (hidden, hidden), jnp.float32, -s2, s2),
        "b2": jax.random.uniform(k4, (1, hidden), jnp.float32, -s2, s2),
        "w3": jax.random.uniform(k5, (hidden, action_dim), jnp.float32, -s2, s2),
        "b3": jax.random.uniform(k6, (1, action_dim), jnp.float32, -s2, s2),
    }


def actor_ref(state, params, max_action, *, bf16_matmul=False):
    """Pure-JAX reference (mirrors the PyTorch forward)."""
    if bf16_matmul:
        mm = lambda x, w: jnp.dot(x.astype(jnp.bfloat16), w.astype(jnp.bfloat16),
                                  preferred_element_type=jnp.float32)
    else:
        mm = lambda x, w: jnp.dot(x, w, preferred_element_type=jnp.float32)
    a = jnp.maximum(mm(state, params["w1"]) + params["b1"], 0.0)
    a = jnp.maximum(mm(a, params["w2"]) + params["b2"], 0.0)
    return max_action * jnp.tanh(mm(a, params["w3"]) + params["b3"])


if __name__ == "__main__":
    key = jax.random.PRNGKey(0)
    kp, ks1, ks2 = jax.random.split(key, 3)

    batch = 8
    state_dim = 16
    action_dim = 8
    max_action = 2.0

    params = init_actor_params(kp, state_dim, action_dim)
    actor = ActorKernel(params, max_action)

    # --- small demo batch (single grid step, tile_b = 8) ----------------------
    state = jax.random.normal(ks1, (batch, state_dim), jnp.float32)
    out = jax.block_until_ready(actor(state))
    assert out.shape == (batch, action_dim)

    ref_mixed = actor_ref(state, params, max_action, bf16_matmul=True)
    ref_f32 = actor_ref(state, params, max_action, bf16_matmul=False)
    assert jnp.allclose(out, ref_mixed, atol=2e-3, rtol=2e-3), \
        "mismatch vs mixed-precision reference"
    assert jnp.allclose(out, ref_f32, atol=5e-2, rtol=5e-2), \
        "mismatch vs f32 reference"

    # --- larger batch: one big tile (tile_b = 512), cached weights reused -----
    big_batch = 512
    state_big = jax.random.normal(ks2, (big_batch, state_dim), jnp.float32)
    out_big = jax.block_until_ready(actor(state_big))
    assert out_big.shape == (big_batch, action_dim)
    ref_big = actor_ref(state_big, params, max_action, bf16_matmul=True)
    assert jnp.allclose(out_big, ref_big, atol=2e-3, rtol=2e-3), \
        "mismatch vs reference (big batch)"

    # --- odd batch: exercises the batch-pad path (5 -> 8 rows) ----------------
    state_odd = state[:5]
    out_odd = jax.block_until_ready(actor(state_odd))
    assert out_odd.shape == (5, action_dim)
    assert jnp.allclose(out_odd, ref_mixed[:5], atol=2e-3, rtol=2e-3), \
        "mismatch vs reference (padded batch)"

    print("KERNEL_OK")
</pallas_src>

<mosaic_0001>
module attributes {stable_mosaic.version = 11 : i64} {
  func.func @_actor_kernel(%arg0: i32, %arg1: memref<1x1xf32, #tpu.memory_space<vmem>>, %arg2: memref<8x16xf32, #tpu.memory_space<vmem>>, %arg3: memref<16x256xbf16, #tpu.memory_space<vmem>>, %arg4: memref<1x256xf32, #tpu.memory_space<vmem>>, %arg5: memref<256x256xbf16, #tpu.memory_space<vmem>>, %arg6: memref<1x256xf32, #tpu.memory_space<vmem>>, %arg7: memref<256x128xbf16, #tpu.memory_space<vmem>>, %arg8: memref<1x128xf32, #tpu.memory_space<vmem>>, %arg9: memref<8x128xf32, #tpu.memory_space<vmem>>) attributes {dimension_semantics = [#tpu.dimension_semantics<arbitrary>], iteration_bounds = array<i64: 1>, scalar_prefetch = 0 : i64, scratch_operands = 0 : i64, tpu.core_type = #tpu.core_type<tc>, window_params = [{pipeline_mode = #tpu.pipeline_mode<synchronous>, transform_indices = @transform_0, window_bounds = array<i64: 1, 1>}, {transform_indices = @transform_1, window_bounds = array<i64: 8, 16>}, {pipeline_mode = #tpu.pipeline_mode<synchronous>, transform_indices = @transform_2, window_bounds = array<i64: 16, 256>}, {pipeline_mode = #tpu.pipeline_mode<synchronous>, transform_indices = @transform_3, window_bounds = array<i64: 1, 256>}, {pipeline_mode = #tpu.pipeline_mode<synchronous>, transform_indices = @transform_4, window_bounds = array<i64: 256, 256>}, {pipeline_mode = #tpu.pipeline_mode<synchronous>, transform_indices = @transform_5, window_bounds = array<i64: 1, 256>}, {pipeline_mode = #tpu.pipeline_mode<synchronous>, transform_indices = @transform_6, window_bounds = array<i64: 256, 128>}, {pipeline_mode = #tpu.pipeline_mode<synchronous>, transform_indices = @transform_7, window_bounds = array<i64: 1, 128>}, {transform_indices = @transform_8, window_bounds = array<i64: 8, 128>}]} {
    %c0 = arith.constant 0 : index
    %c0_0 = arith.constant 0 : index
    %0 = vector.load %arg2[%c0, %c0_0] : memref<8x16xf32, #tpu.memory_space<vmem>>, vector<8x16xf32>
    %1 = arith.truncf %0 : vector<8x16xf32> to vector<8x16xbf16>
    %c0_1 = arith.constant 0 : index
    %c0_2 = arith.constant 0 : index
    %2 = vector.load %arg3[%c0_1, %c0_2] : memref<16x256xbf16, #tpu.memory_space<vmem>>, vector<16x256xbf16>
    %cst = arith.constant dense<0.000000e+00> : vector<8x256xf32>
    %3 = tpu.matmul %1, %2, %cst {dimension_numbers = #tpu.dot_dimension_numbers<[1], [0], [0], [1], [0, 0, 1, 1], [], []>} : vector<8x16xbf16>, vector<16x256xbf16>, vector<8x256xf32> -> vector<8x256xf32>
    %c0_3 = arith.constant 0 : index
    %c0_4 = arith.constant 0 : index
    %4 = vector.load %arg4[%c0_3, %c0_4] : memref<1x256xf32, #tpu.memory_space<vmem>>, vector<1x256xf32>
    %5 = vector.broadcast %4 : vector<1x256xf32> to vector<8x256xf32>
    %6 = arith.addf %3, %5 : vector<8x256xf32>
    %cst_5 = arith.constant 0.000000e+00 : f32
    %7 = vector.broadcast %cst_5 : f32 to vector<8x256xf32>
    %8 = arith.maximumf %6, %7 : vector<8x256xf32>
    %9 = arith.truncf %8 : vector<8x256xf32> to vector<8x256xbf16>
    %c0_6 = arith.constant 0 : index
    %c0_7 = arith.constant 0 : index
    %10 = vector.load %arg5[%c0_6, %c0_7] : memref<256x256xbf16, #tpu.memory_space<vmem>>, vector<256x256xbf16>
    %cst_8 = arith.constant dense<0.000000e+00> : vector<8x256xf32>
    %11 = tpu.matmul %9, %10, %cst_8 {dimension_numbers = #tpu.dot_dimension_numbers<[1], [0], [0], [1], [0, 0, 1, 1], [], []>} : vector<8x256xbf16>, vector<256x256xbf16>, vector<8x256xf32> -> vector<8x256xf32>
    %c0_9 = arith.constant 0 : index
    %c0_10 = arith.constant 0 : index
    %12 = vector.load %arg6[%c0_9, %c0_10] : memref<1x256xf32, #tpu.memory_space<vmem>>, vector<1x256xf32>
    %13 = vector.broadcast %12 : vector<1x256xf32> to vector<8x256xf32>
    %14 = arith.addf %11, %13 : vector<8x256xf32>
    %cst_11 = arith.constant 0.000000e+00 : f32
    %15 = vector.broadcast %cst_11 : f32 to vector<8x256xf32>
    %16 = arith.maximumf %14, %15 : vector<8x256xf32>
    %17 = arith.truncf %16 : vector<8x256xf32> to vector<8x256xbf16>
    %c0_12 = arith.constant 0 : index
    %c0_13 = arith.constant 0 : index
    %18 = vector.load %arg7[%c0_12, %c0_13] : memref<256x128xbf16, #tpu.memory_space<vmem>>, vector<256x128xbf16>
    %cst_14 = arith.constant dense<0.000000e+00> : vector<8x128xf32>
    %19 = tpu.matmul %17, %18, %cst_14 {dimension_numbers = #tpu.dot_dimension_numbers<[1], [0], [0], [1], [0, 0, 1, 1], [], []>} : vector<8x256xbf16>, vector<256x128xbf16>, vector<8x128xf32> -> vector<8x128xf32>
    %c0_15 = arith.constant 0 : index
    %c0_16 = arith.constant 0 : index
    %20 = vector.load %arg1[%c0_15, %c0_16] : memref<1x1xf32, #tpu.memory_space<vmem>>, vector<1x1xf32>
    %c0_17 = arith.constant 0 : index
    %c0_18 = arith.constant 0 : index
    %21 = vector.load %arg8[%c0_17, %c0_18] : memref<1x128xf32, #tpu.memory_space<vmem>>, vector<1x128xf32>
    %22 = vector.broadcast %21 : vector<1x128xf32> to vector<8x128xf32>
    %23 = arith.addf %19, %22 : vector<8x128xf32>
    %24 = math.tanh %23 : vector<8x128xf32>
    %25 = vector.broadcast %20 : vector<1x1xf32> to vector<8x128xf32>
    %26 = arith.mulf %25, %24 : vector<8x128xf32>
    %c0_19 = arith.constant 0 : index
    %c0_20 = arith.constant 0 : index
    %27 = vector.load %arg9[%c0_19, %c0_20] : memref<8x128xf32, #tpu.memory_space<vmem>>, vector<8x128xf32>
    tpu.vector_store %arg9[%c0_19, %c0_20], %26 {strides = array<i32>} : memref<8x128xf32, #tpu.memory_space<vmem>>, vector<8x128xf32>,
    return
  }
  func.func @transform_0(%arg0: i32) -> (i32, i32) {
    %c0_i32 = arith.constant 0 : i32
    %c0_i32_0 = arith.constant 0 : i32
    %c0_i32_1 = arith.constant 0 : i32
    return %c0_i32, %c0_i32_0 : i32, i32
  }
  func.func @transform_1(%arg0: i32) -> (i32, i32) {
    %c0_i32 = arith.constant 0 : i32
    %c0_i32_0 = arith.constant 0 : i32
    return %arg0, %c0_i32 : i32, i32
  }
  func.func @transform_2(%arg0: i32) -> (i32, i32) {
    %c0_i32 = arith.constant 0 : i32
    %c0_i32_0 = arith.constant 0 : i32
    %c0_i32_1 = arith.constant 0 : i32
    return %c0_i32, %c0_i32_0 : i32, i32
  }
  func.func @transform_3(%arg0: i32) -> (i32, i32) {
    %c0_i32 = arith.constant 0 : i32
    %c0_i32_0 = arith.constant 0 : i32
    %c0_i32_1 = arith.constant 0 : i32
    return %c0_i32, %c0_i32_0 : i32, i32
  }
  func.func @transform_4(%arg0: i32) -> (i32, i32) {
    %c0_i32 = arith.constant 0 : i32
    %c0_i32_0 = arith.constant 0 : i32
    %c0_i32_1 = arith.constant 0 : i32
    return %c0_i32, %c0_i32_0 : i32, i32
  }
  func.func @transform_5(%arg0: i32) -> (i32, i32) {
    %c0_i32 = arith.constant 0 : i32
    %c0_i32_0 = arith.constant 0 : i32
    %c0_i32_1 = arith.constant 0 : i32
    return %c0_i32, %c0_i32_0 : i32, i32
  }
  func.func @transform_6(%arg0: i32) -> (i32, i32) {
    %c0_i32 = arith.constant 0 : i32
    %c0_i32_0 = arith.constant 0 : i32
    %c0_i32_1 = arith.constant 0 : i32
    return %c0_i32, %c0_i32_0 : i32, i32
  }
  func.func @transform_7(%arg0: i32) -> (i32, i32) {
    %c0_i32 = arith.constant 0 : i32
    %c0_i32_0 = arith.constant 0 : i32
    %c0_i32_1 = arith.constant 0 : i32
    return %c0_i32, %c0_i32_0 : i32, i32
  }
  func.func @transform_8(%arg0: i32) -> (i32, i32) {
    %c0_i32 = arith.constant 0 : i32
    %c0_i32_0 = arith.constant 0 : i32
    return %arg0, %c0_i32 : i32, i32
  }
}

module attributes {stable_mosaic.version = 11 : i64} {
  func.func @_actor_kernel(%arg0: i32, %arg1: memref<1x1xf32, #tpu.memory_space<vmem>>, %arg2: memref<8x16xf32, #tpu.memory_space<vmem>>, %arg3: memref<16x256xbf16, #tpu.memory_space<vmem>>, %arg4: memref<1x256xf32, #tpu.memory_space<vmem>>, %arg5: memref<256x256xbf16, #tpu.memory_space<vmem>>, %arg6: memref<1x256xf32, #tpu.memory_space<vmem>>, %arg7: memref<256x128xbf16, #tpu.memory_space<vmem>>, %arg8: memref<1x128xf32, #tpu.memory_space<vmem>>, %arg9: memref<8x128xf32, #tpu.memory_space<vmem>>) attributes {dimension_semantics = [#tpu.dimension_semantics<arbitrary>], iteration_bounds = array<i64: 1>, scalar_prefetch = 0 : i64, scratch_operands = 0 : i64, tpu.core_type = #tpu.core_type<tc>, window_params = [{pipeline_mode = #tpu.pipeline_mode<synchronous>, transform_indices = @transform_0, window_bounds = array<i64: 1, 1>}, {transform_indices = @transform_1, window_bounds = array<i64: 8, 16>}, {pipeline_mode = #tpu.pipeline_mode<synchronous>, transform_indices = @transform_2, window_bounds = array<i64: 16, 256>}, {pipeline_mode = #tpu.pipeline_mode<synchronous>, transform_indices = @transform_3, window_bounds = array<i64: 1, 256>}, {pipeline_mode = #tpu.pipeline_mode<synchronous>, transform_indices = @transform_4, window_bounds = array<i64: 256, 256>}, {pipeline_mode = #tpu.pipeline_mode<synchronous>, transform_indices = @transform_5, window_bounds = array<i64: 1, 256>}, {pipeline_mode = #tpu.pipeline_mode<synchronous>, transform_indices = @transform_6, window_bounds = array<i64: 256, 128>}, {pipeline_mode = #tpu.pipeline_mode<synchronous>, transform_indices = @transform_7, window_bounds = array<i64: 1, 128>}, {transform_indices = @transform_8, window_bounds = array<i64: 8, 128>}]} {
    %c0 = arith.constant 0 : index
    %c0_0 = arith.constant 0 : index
    %0 = vector.load %arg2[%c0, %c0_0] : memref<8x16xf32, #tpu.memory_space<vmem>>, vector<8x16xf32>
    %1 = arith.truncf %0 : vector<8x16xf32> to vector<8x16xbf16>
    %c0_1 = arith.constant 0 : index
    %c0_2 = arith.constant 0 : index
    %2 = vector.load %arg3[%c0_1, %c0_2] : memref<16x256xbf16, #tpu.memory_space<vmem>>, vector<16x256xbf16>
    %cst = arith.constant dense<0.000000e+00> : vector<8x256xf32>
    %3 = tpu.matmul %1, %2, %cst {dimension_numbers = #tpu.dot_dimension_numbers<[1], [0], [0], [1], [0, 0, 1, 1], [], []>} : vector<8x16xbf16>, vector<16x256xbf16>, vector<8x256xf32> -> vector<8x256xf32>
    %c0_3 = arith.constant 0 : index
    %c0_4 = arith.constant 0 : index
    %4 = vector.load %arg4[%c0_3, %c0_4] : memref<1x256xf32, #tpu.memory_space<vmem>>, vector<1x256xf32>
    %5 = vector.broadcast %4 : vector<1x256xf32> to vector<8x256xf32>
    %6 = arith.addf %3, %5 : vector<8x256xf32>
    %cst_5 = arith.constant 0.000000e+00 : f32
    %7 = vector.broadcast %cst_5 : f32 to vector<8x256xf32>
    %8 = arith.maximumf %6, %7 : vector<8x256xf32>
    %9 = arith.truncf %8 : vector<8x256xf32> to vector<8x256xbf16>
    %c0_6 = arith.constant 0 : index
    %c0_7 = arith.constant 0 : index
    %10 = vector.load %arg5[%c0_6, %c0_7] : memref<256x256xbf16, #tpu.memory_space<vmem>>, vector<256x256xbf16>
    %cst_8 = arith.constant dense<0.000000e+00> : vector<8x256xf32>
    %11 = tpu.matmul %9, %10, %cst_8 {dimension_numbers = #tpu.dot_dimension_numbers<[1], [0], [0], [1], [0, 0, 1, 1], [], []>} : vector<8x256xbf16>, vector<256x256xbf16>, vector<8x256xf32> -> vector<8x256xf32>
    %c0_9 = arith.constant 0 : index
    %c0_10 = arith.constant 0 : index
    %12 = vector.load %arg6[%c0_9, %c0_10] : memref<1x256xf32, #tpu.memory_space<vmem>>, vector<1x256xf32>
    %13 = vector.broadcast %12 : vector<1x256xf32> to vector<8x256xf32>
    %14 = arith.addf %11, %13 : vector<8x256xf32>
    %cst_11 = arith.constant 0.000000e+00 : f32
    %15 = vector.broadcast %cst_11 : f32 to vector<8x256xf32>
    %16 = arith.maximumf %14, %15 : vector<8x256xf32>
    %17 = arith.truncf %16 : vector<8x256xf32> to vector<8x256xbf16>
    %c0_12 = arith.constant 0 : index
    %c0_13 = arith.constant 0 : index
    %18 = vector.load %arg7[%c0_12, %c0_13] : memref<256x128xbf16, #tpu.memory_space<vmem>>, vector<256x128xbf16>
    %cst_14 = arith.constant dense<0.000000e+00> : vector<8x128xf32>
    %19 = tpu.matmul %17, %18, %cst_14 {dimension_numbers = #tpu.dot_dimension_numbers<[1], [0], [0], [1], [0, 0, 1, 1], [], []>} : vector<8x256xbf16>, vector<256x128xbf16>, vector<8x128xf32> -> vector<8x128xf32>
    %c0_15 = arith.constant 0 : index
    %c0_16 = arith.constant 0 : index
    %20 = vector.load %arg1[%c0_15, %c0_16] : memref<1x1xf32, #tpu.memory_space<vmem>>, vector<1x1xf32>
    %c0_17 = arith.constant 0 : index
    %c0_18 = arith.constant 0 : index
    %21 = vector.load %arg8[%c0_17, %c0_18] : memref<1x128xf32, #tpu.memory_space<vmem>>, vector<1x128xf32>
    %22 = vector.broadcast %21 : vector<1x128xf32> to vector<8x128xf32>
    %23 = arith.addf %19, %22 : vector<8x128xf32>
    %24 = math.tanh %23 : vector<8x128xf32>
    %25 = vector.broadcast %20 : vector<1x1xf32> to vector<8x128xf32>
    %26 = arith.mulf %25, %24 : vector<8x128xf32>
    %c0_19 = arith.constant 0 : index
    %c0_20 = arith.constant 0 : index
    %27 = vector.load %arg9[%c0_19, %c0_20] : memref<8x128xf32, #tpu.memory_space<vmem>>, vector<8x128xf32>
    tpu.vector_store %arg9[%c0_19, %c0_20], %26 {strides = array<i32>} : memref<8x128xf32, #tpu.memory_space<vmem>>, vector<8x128xf32>,
    return
  }
  func.func @transform_0(%arg0: i32) -> (i32, i32) {
    %c0_i32 = arith.constant 0 : i32
    %c0_i32_0 = arith.constant 0 : i32
    %c0_i32_1 = arith.constant 0 : i32
    return %c0_i32, %c0_i32_0 : i32, i32
  }
  func.func @transform_1(%arg0: i32) -> (i32, i32) {
    %c0_i32 = arith.constant 0 : i32
    %c0_i32_0 = arith.constant 0 : i32
    return %arg0, %c0_i32 : i32, i32
  }
  func.func @transform_2(%arg0: i32) -> (i32, i32) {
    %c0_i32 = arith.constant 0 : i32
    %c0_i32_0 = arith.constant 0 : i32
    %c0_i32_1 = arith.constant 0 : i32
    return %c0_i32, %c0_i32_0 : i32, i32
  }
  func.func @transform_3(%arg0: i32) -> (i32, i32) {
    %c0_i32 = arith.constant 0 : i32
    %c0_i32_0 = arith.constant 0 : i32
    %c0_i32_1 = arith.constant 0 : i32
    return %c0_i32, %c0_i32_0 : i32, i32
  }
  func.func @transform_4(%arg0: i32) -> (i32, i32) {
    %c0_i32 = arith.constant 0 : i32
    %c0_i32_0 = arith.constant 0 : i32
    %c0_i32_1 = arith.constant 0 : i32
    return %c0_i32, %c0_i32_0 : i32, i32
  }
  func.func @transform_5(%arg0: i32) -> (i32, i32) {
    %c0_i32 = arith.constant 0 : i32
    %c0_i32_0 = arith.constant 0 : i32
    %c0_i32_1 = arith.constant 0 : i32
    return %c0_i32, %c0_i32_0 : i32, i32
  }
  func.func @transform_6(%arg0: i32) -> (i32, i32) {
    %c0_i32 = arith.constant 0 : i32
    %c0_i32_0 = arith.constant 0 : i32
    %c0_i32_1 = arith.constant 0 : i32
    return %c0_i32, %c0_i32_0 : i32, i32
  }
  func.func @transform_7(%arg0: i32) -> (i32, i32) {
    %c0_i32 = arith.constant 0 : i32
    %c0_i32_0 = arith.constant 0 : i32
    %c0_i32_1 = arith.constant 0 : i32
    return %c0_i32, %c0_i32_0 : i32, i32
  }
  func.func @transform_8(%arg0: i32) -> (i32, i32) {
    %c0_i32 = arith.constant 0 : i32
    %c0_i32_0 = arith.constant 0 : i32
    return %arg0, %c0_i32 : i32, i32
  }
}

</mosaic_0001>

<bundles_post_ra>
// kernel: fwd.1
= control target key start
LH: loop header
LB: loop body
LE: loop exit
PB: predicated region body
PF: predicated region fallthrough
CT: control target
= control target key end

     0   :  { %s960_s0 = inlined_call_operand.<no memory space> [shape: f32[1,1], index: 0, kind: input, shape index: {}]   ;;  %s961_s1 = inlined_call_operand.hbm [shape: f32[8,16], index: 1, kind: input, shape index: {}]   ;;  %s962_s2 = inlined_call_operand.hbm [shape: bf16[16,256], index: 2, kind: input, shape index: {}]   ;;  %s963_s3 = inlined_call_operand.vmem [shape: f32[1,256], index: 3, kind: input, shape index: {}]   ;;  %s964_s4 = inlined_call_operand.hbm [shape: bf16[256,256], index: 4, kind: input, shape index: {}]   ;;  %s965_s5 = inlined_call_operand.vmem [shape: f32[1,256], index: 5, kind: input, shape index: {}]   ;;  %s966_s6 = inlined_call_operand.hbm [shape: bf16[256,128], index: 6, kind: input, shape index: {}]   ;;  %s967_s7 = inlined_call_operand.vmem [shape: f32[1,128], index: 7, kind: input, shape index: {}]   ;;  %s968_s8 = inlined_call_operand.hbm [shape: f32[8,128], index: 8, kind: output, shape index: {}]  }
   0x1   :  { %v13_v0 = vstv %s960_s0 }
   0x2   :  { %14 = vst [vmem:[#allocation2] sm:$0x1] %v13_v0 }
   0x3   :  { %15 = vsyncpa [#allocation4], 0 }
   0x4   :  { %16 = vsyncpa [#allocation7], 0 }
   0x5   :  { %17 = vsyncpa [#allocation10], 0 }
   0x6   :  { %18 = vsyncpa [#allocation5], 0  ;;  %s878_s29 = smov [#allocation6]  }
   0x7   :  { %s36_s30 = sshll.u32 %s878_s29, 4  ;;  %s37_s30 = int_to_ptr.vmem [resolvable:$true] %s36_s30 }
   0x8   :  { %s778_s9 = scalar_lea.vmem %s37_s30, 256  ;;  %p783_p1 = scmp.lt.s32.totalorder %s37_s30, %s37_s30 }
   0x9   :  { %p779_p0 = scmp.ne.s32.totalorder %s37_s30, %s778_s9  ;;  %p784_p2 = scmp.lt.s32.totalorder %s778_s9, %s778_s9 }
   0xb   :  { %p785_p3 = por %p784_p2, %p783_p1 }
   0xd   :  { %p786_p4 = pnand %p785_p3, %p779_p0 }
   0xf   :  { %789 = shalt.err (!%p786_p4)
}
  0x10   :  { %s879_s10 = smov 128   ;;  %s880_s11 = smov 8  }
  0x11   :  { %42 = dma.hbm_to_vmem [thread:$0]  %s962_s2, 256, %s37_s30, [#allocation7], %s879_s10, %s879_s10, %s880_s11  }
  0x12   :  { %s881_s0 = smov [#allocation3]   ;;  %s882_s15 = smov [#allocation8]  }
  0x13   :  { %s27_s14 = sshll.u32 %s881_s0, 4  ;;  %s50_s16 = sshll.u32 %s882_s15, 4  ;;  %s28_s14 = int_to_ptr.vmem [resolvable:$true] %s27_s14  ;;  %s51_s16 = int_to_ptr.vmem [resolvable:$true] %s50_s16 }
  0x14   :  { %s798_s17 = scalar_lea.vmem %s28_s14, 128  ;;  %p803_p6 = scmp.lt.s32.totalorder %s28_s14, %s28_s14 }
  0x15   :  { %p799_p5 = scmp.ne.s32.totalorder %s28_s14, %s798_s17  ;;  %p804_p7 = scmp.lt.s32.totalorder %s798_s17, %s798_s17 }
  0x17   :  { %p805_p8 = por %p804_p7, %p803_p6 }
  0x19   :  { %p806_p9 = pnand %p805_p8, %p799_p5 }
  0x1b   :  { %809 = shalt.err (!%p806_p9)
}
  0x1c   :  { %30 = dma.hbm_to_vmem [thread:$0]  %s961_s1, 128, %s28_s14, [#allocation4]  }
  0x1d   :  { %s818_s20 = scalar_lea.vmem %s51_s16, 4096  ;;  %p823_p11 = scmp.lt.s32.totalorder %s51_s16, %s51_s16 }
  0x1e   :  { %p819_p10 = scmp.ne.s32.totalorder %s51_s16, %s818_s20  ;;  %p824_p12 = scmp.lt.s32.totalorder %s818_s20, %s818_s20 }
  0x20   :  { %p825_p13 = por %p824_p12, %p823_p11 }
  0x22   :  { %p826_p0 = pnand %p825_p13, %p819_p10 }
  0x24   :  { %829 = shalt.err (!%p826_p0)
}
  0x25   :  { %56 = dma.hbm_to_vmem [thread:$0]  %s964_s4, 4096, %s51_s16, [#allocation7], %s879_s10, %s879_s10, %s880_s11  }
  0x26   :  { %s883_s22 = smov [#allocation9]  }
  0x27   :  { %s64_s23 = sshll.u32 %s883_s22, 4  ;;  %s65_s23 = int_to_ptr.vmem [resolvable:$true] %s64_s23 }
  0x28   :  { %s838_s24 = scalar_lea.vmem %s65_s23, 2048  ;;  %p843_p2 = scmp.lt.s32.totalorder %s65_s23, %s65_s23 }
  0x29   :  { %p839_p1 = scmp.ne.s32.totalorder %s65_s23, %s838_s24  ;;  %p844_p3 = scmp.lt.s32.totalorder %s838_s24, %s838_s24 }
  0x2b   :  { %p845_p4 = por %p844_p3, %p843_p2 }
  0x2d   :  { %p846_p5 = pnand %p845_p4, %p839_p1 }
  0x2f   :  { %849 = shalt.err (!%p846_p5)
}
  0x30   :  { %s884_s1 = smov 64   ;;  %s885_s25 = smov 4  }
  0x31   :  { %70 = dma.hbm_to_vmem [thread:$0]  %s966_s6, 2048, %s65_s23, [#allocation10], %s884_s1, %s884_s1, %s885_s25  }
  0x32   :  { %870 = dma.done.wait [#allocation4], 128  }
  0x33   :  { %871 = vsyncadd [#allocation4], 4294967168 }
  0x34   :  { %872 = dma.done.wait [#allocation7], 4352  }
  0x35   :  { %873 = vsyncadd [#allocation7], 4294962944 }
  0x36   :  { %874 = dma.done.wait [#allocation10], 2048  }
  0x37   :  { %875 = vsyncadd [#allocation10], 4294965248  ;;  %v886_v1 = vmov 0   ;;  %v701_v2 = vld [vmem:[#allocation6 + $0x4] ss:$8 sps:$4 sm:$0xff]   ;;  %v86_v4 = vld [vmem:[#allocation3] sm:$0xff]  ;;  %v92_v50 = vlaneseq }
  0x38   :  { %148 = vmatprep.mubr.bf16.mxu0 %v886_v1  ;;  %700 = vset.pattern.permute.xlu0 %v886_v1  ;;  %v703_v3 = vld [vmem:[#allocation6] ss:$8 sps:$4 sm:$0xff]   ;;  %v87_v5 = vpack.c.bf16 %v86_v4, %v86_v4  ;;  %v704_v6 = vld [vmem:[#allocation8 + $0x74] ss:$8 sps:$4 sm:$0xff]   ;;  %vm112_vm0 = vcmask 130048   ;;  %v756_v42 = vld [vmem:[#allocation9 + $0x68] sm:$0xff]  }
  0x39   :  { %130 = vmatprep.subr.bf16.mxu0 %v701_v2  ;;  %v706_v7 = vld [vmem:[#allocation8 + $0x70] ss:$8 sps:$4 sm:$0xff]   ;;  %v707_v8 = vld [vmem:[#allocation8 + $0x64] ss:$8 sps:$4 sm:$0xff]   ;;  %365 = vmatprep.subr.bf16.mxu1 %v704_v6  ;;  %v709_v9 = vld [vmem:[#allocation8 + $0x60] ss:$8 sps:$4 sm:$0xff]  }
  0x3a   :  { %131 = vmatpush1.bf16.msra.mxu0 %v703_v3  ;;  %366 = vmatpush1.bf16.msra.mxu1 %v706_v7  ;;  %v710_v10 = vld [vmem:[#allocation8 + $0x54] ss:$8 sps:$4 sm:$0xff]   ;;  %v712_v11 = vld [vmem:[#allocation8 + $0x50] ss:$8 sps:$4 sm:$0xff]   ;;  %v713_v12 = vld [vmem:[#allocation8 + $0x44] ss:$8 sps:$4 sm:$0xff]  }
  0x3b   :  { %367 = vmatprep.subr.bf16.mxu1 %v707_v8  ;;  %v715_v13 = vld [vmem:[#allocation8 + $0x40] ss:$8 sps:$4 sm:$0xff]   ;;  %v716_v14 = vld [vmem:[#allocation8 + $0x34] ss:$8 sps:$4 sm:$0xff]   ;;  %v718_v15 = vld [vmem:[#allocation8 + $0x30] ss:$8 sps:$4 sm:$0xff]  }
  0x3c   :  { %v719_v16 = vld [vmem:[#allocation8 + $0x24] ss:$8 sps:$4 sm:$0xff]   ;;  %v721_v17 = vld [vmem:[#allocation8 + $0x20] ss:$8 sps:$4 sm:$0xff]   ;;  %v722_v18 = vld [vmem:[#allocation8 + $0x14] ss:$8 sps:$4 sm:$0xff]  }
  0x3d   :  { %617 = vmatmul.mubr.msk.bf16.vlgmr.msra.gmra.mxu0 %vm112_vm0, %v87_v5  ;;  %v724_v19 = vld [vmem:[#allocation8 + $0x10] ss:$8 sps:$4 sm:$0xff]   ;;  %v725_v20 = vld [vmem:[#allocation8 + $0x4] ss:$8 sps:$4 sm:$0xff]   ;;  %v727_v21 = vld [vmem:[#allocation8] ss:$8 sps:$4 sm:$0xff]  }
  0x3e   :  { %368 = vmatpush1.bf16.msra.mxu1 %v709_v9  ;;  %v728_v22 = vld [vmem:[#allocation8 + $0xf4] ss:$8 sps:$4 sm:$0xff]   ;;  %v730_v23 = vld [vmem:[#allocation8 + $0xf0] ss:$8 sps:$4 sm:$0xff]   ;;  %v731_v24 = vld [vmem:[#allocation8 + $0xe4] ss:$8 sps:$4 sm:$0xff]  }
  0x3f   :  { %369 = vmatprep.subr.bf16.mxu1 %v710_v10  ;;  %v733_v25 = vld [vmem:[#allocation8 + $0xe0] ss:$8 sps:$4 sm:$0xff]   ;;  %v734_v26 = vld [vmem:[#allocation8 + $0xd4] ss:$8 sps:$4 sm:$0xff]   ;;  %v736_v27 = vld [vmem:[#allocation8 + $0xd0] ss:$8 sps:$4 sm:$0xff]  }
  0x40   :  { %v737_v28 = vld [vmem:[#allocation8 + $0xc4] ss:$8 sps:$4 sm:$0xff]   ;;  %v739_v29 = vld [vmem:[#allocation8 + $0xc0] ss:$8 sps:$4 sm:$0xff]   ;;  %v740_v30 = vld [vmem:[#allocation8 + $0xb4] ss:$8 sps:$4 sm:$0xff]  }
  0x41   :  { %v742_v31 = vld [vmem:[#allocation8 + $0xb0] ss:$8 sps:$4 sm:$0xff]   ;;  %v743_v32 = vld [vmem:[#allocation8 + $0xa4] ss:$8 sps:$4 sm:$0xff]   ;;  %v745_v33 = vld [vmem:[#allocation8 + $0xa0] ss:$8 sps:$4 sm:$0xff]  }
  0x42   :  { %370 = vmatpush1.bf16.msra.mxu1 %v712_v11  ;;  %v746_v34 = vld [vmem:[#allocation8 + $0x94] ss:$8 sps:$4 sm:$0xff]   ;;  %v748_v35 = vld [vmem:[#allocation8 + $0x90] ss:$8 sps:$4 sm:$0xff]   ;;  %v749_v36 = vld [vmem:[#allocation8 + $0x84] ss:$8 sps:$4 sm:$0xff]  }
  0x43   :  { %371 = vmatprep.subr.bf16.mxu1 %v713_v12  ;;  %v751_v37 = vld [vmem:[#allocation8 + $0x80] ss:$8 sps:$4 sm:$0xff]   ;;  %v752_v38 = vld [vmem:[#allocation9 + $0x78] sm:$0xff]   ;;  %v754_v40 = vld [vmem:[#allocation9 + $0x70] sm:$0xff]   ;;  %v93_v51 = vshrl.u32 %v92_v50, 7 }
  0x44   :  { %v753_v39 = vld [vmem:[#allocation9 + $0x38] sm:$0xff]   ;;  %668 = vmatprep.subr.bf16.mxu0 %v752_v38  ;;  %v755_v41 = vld [vmem:[#allocation9 + $0x30] sm:$0xff]   ;;  %v757_v43 = vld [vmem:[#allocation9 + $0x28] sm:$0xff]  }
  0x45   :  { %669 = vmatpush3.bf16.msra.mxu0 %v753_v39  ;;  %v758_v44 = vld [vmem:[#allocation9 + $0x60] sm:$0xff]   ;;  %v760_v46 = vld [vmem:[#allocation9 + $0x58] sm:$0xff]   ;;  %v762_v48 = vld [vmem:[#allocation9 + $0x50] sm:$0xff]   ;;  %v94_v52 = vsub.s32 0, %v93_v51  ;;  %v98_v54 = vsub.s32 1, %v93_v51 }
  0x46   :  { %372 = vmatpush1.bf16.msra.mxu1 %v715_v13  ;;  %670 = vmatprep.subr.bf16.mxu0 %v754_v40  ;;  %v759_v45 = vld [vmem:[#allocation9 + $0x20] sm:$0xff]   ;;  %v761_v47 = vld [vmem:[#allocation9 + $0x18] sm:$0xff]   ;;  %v763_v49 = vld [vmem:[#allocation9 + $0x10] sm:$0xff]  }
  0x47   :  { %373 = vmatprep.subr.bf16.mxu1 %v716_v14  ;;  %v90_v53 = vld [vmem:[%s963_s3] sm:$0x3] }
  0x48   :  { %v95_v55 = vrot.slane %v90_v53, %v94_v52  ;;  %v99_v56 = vrot.slane %v90_v53, %v98_v54  ;;  %v764_v3 = vld [vmem:[#allocation9 + $0x48] sm:$0xff]   ;;  %v766_v5 = vld [vmem:[#allocation9 + $0x40] sm:$0xff]  }
  0x49   :  { %671 = vmatpush3.bf16.msra.mxu0 %v755_v41  ;;  %v765_v4 = vld [vmem:[#allocation9 + $0x8] sm:$0xff]   ;;  %v767_v6 = vld [vmem:[#allocation9] sm:$0xff]  }
  0x4a   :  { %374 = vmatpush1.bf16.msra.mxu1 %v718_v15  ;;  %672 = vmatprep.subr.bf16.mxu0 %v756_v42  ;;  %v667_v7 = vld [vmem:[#allocation2] ss:$0 sm:$0xff] }
  0x4b   :  { %375 = vmatprep.subr.bf16.mxu1 %v719_v16  ;;  %593 = vperm.xlu0 %700, %v667_v7   ;;  %v193_v8 = vld [vmem:[%s965_s5] sm:$0x3]  ;;  %s887_s5 = smov [#allocation11]  }
  0x4c   :  { %v198_v9 = vrot.slane %v193_v8, %v94_v52  ;;  %v202_v10 = vrot.slane %v193_v8, %v98_v54  ;;  %s604_s9 = sshll.u32 %s887_s5, 4  ;;  %s605_s9 = int_to_ptr.vmem [resolvable:$true] %s604_s9 }
  0x4d   :  { %673 = vmatpush3.bf16.msra.mxu0 %v757_v43  ;;  %s850_s10 = scalar_lea.vmem %s605_s9, 128  ;;  %p855_p7 = scmp.lt.s32.totalorder %s605_s9, %s605_s9 }
  0x4e   :  { %376 = vmatpush1.bf16.msra.mxu1 %v721_v17  ;;  %674 = vmatprep.subr.bf16.mxu0 %v758_v44  ;;  %p851_p6 = scmp.ne.s32.totalorder %s605_s9, %s850_s10  ;;  %p856_p8 = scmp.lt.s32.totalorder %s850_s10, %s850_s10 }
  0x4f   :  { %377 = vmatprep.subr.bf16.mxu1 %v722_v18 }
  0x50   :  { %p857_p9 = por %p856_p8, %p855_p7 }
  0x51   :  { %675 = vmatpush3.bf16.msra.mxu0 %v759_v45 }
  0x52   :  { %378 = vmatpush1.bf16.msra.mxu1 %v724_v19  ;;  %676 = vmatprep.subr.bf16.mxu0 %v760_v46  ;;  %p858_p10 = pnand %p857_p9, %p851_p6 }
  0x53   :  { %379 = vmatprep.subr.bf16.mxu1 %v725_v20 }
  0x55   :  { %677 = vmatpush3.bf16.msra.mxu0 %v761_v47 }
  0x56   :  { %380 = vmatpush1.bf16.msra.mxu1 %v727_v21  ;;  %678 = vmatprep.subr.bf16.mxu0 %v762_v48 }
  0x57   :  { %381 = vmatprep.subr.bf16.mxu1 %v728_v22  ;;  %v650_v22 = vld [vmem:[%s967_s7] ss:$0 sm:$0xff] }
  0x59   :  { %679 = vmatpush3.bf16.msra.mxu0 %v763_v49 }
  0x5a   :  { %382 = vmatpush2.bf16.msra.mxu1 %v730_v23  ;;  %680 = vmatprep.subr.bf16.mxu0 %v764_v3 }
  0x5b   :  { %383 = vmatprep.subr.bf16.mxu1 %v731_v24 }
  0x5d   :  { %681 = vmatpush3.bf16.msra.mxu0 %v765_v4 }
  0x5e   :  { %384 = vmatpush2.bf16.msra.mxu1 %v733_v25  ;;  %682 = vmatprep.subr.bf16.mxu0 %v766_v5 }
  0x5f   :  { %385 = vmatprep.subr.bf16.mxu1 %v734_v26 }
  0x61   :  { %683 = vmatpush3.bf16.msra.mxu0 %v767_v6 }
  0x62   :  { %386 = vmatpush2.bf16.msra.mxu1 %v736_v27 }
  0x63   :  { %387 = vmatprep.subr.bf16.mxu1 %v737_v28 }
  0x66   :  { %388 = vmatpush2.bf16.msra.mxu1 %v739_v29 }
  0x67   :  { %389 = vmatprep.subr.bf16.mxu1 %v740_v30 }
  0x6a   :  { %390 = vmatpush2.bf16.msra.mxu1 %v742_v31 }
  0x6b   :  { %391 = vmatprep.subr.bf16.mxu1 %v743_v32 }
  0x6e   :  { %392 = vmatpush2.bf16.msra.mxu1 %v745_v33 }
  0x6f   :  { %393 = vmatprep.subr.bf16.mxu1 %v746_v34 }
  0x72   :  { %394 = vmatpush2.bf16.msra.mxu1 %v748_v35 }
  0x73   :  { %395 = vmatprep.subr.bf16.mxu1 %v749_v36 }
  0x76   :  { %396 = vmatpush2.bf16.msra.mxu1 %v751_v37 }
  0xc6   :  { %v594_v28 = vpop.permute.xlu0 %593 }
  0xfd   :  { %v150_v57 = vpop.f32.mrf.mxu0 }
  0xfe   :  { %v151_v58 = vadd.f32 %v150_v57, %v95_v55 }
  0xff   :  { %v152_v59 = vpop.f32.mrf.mxu0 }
 0x100   :  { %v153_v60 = vadd.f32 %v152_v59, %v99_v56  ;;  %v157_v61 = vmax.f32 %v151_v58, 0.0 }
 0x101   :  { %v154_v62 = vpop.f32.mrf.mxu0 }
 0x102   :  { %v158_v63 = vmax.f32 %v153_v60, 0.0  ;;  %v159_v2 = vpack.c.bf16 %v157_v61, %v157_v61 }
 0x103   :  { %v155_v0 = vpop.f32.mrf.mxu0 }
 0x104   :  { %v160_v1 = vpack.c.bf16 %v158_v63, %v158_v63 }
 0x106   :  { %397 = vmatprep.mubr.bf16.mxu1 %v160_v1 }
 0x107   :  { %398 = vmatmul.mubr.bf16.vlgmr.msra.gmra.mxu1 %v159_v2 }
 0x1c7   :  { %v399_v11 = vpop.f32.mrf.mxu1 }
 0x1c8   :  { %v400_v12 = vadd.f32 %v399_v11, %v198_v9 }
 0x1c9   :  { %v401_v13 = vpop.f32.mrf.mxu1 }
 0x1ca   :  { %v402_v14 = vadd.f32 %v401_v13, %v202_v10  ;;  %v406_v15 = vmax.f32 %v400_v12, 0.0 }
 0x1cb   :  { %v403_v16 = vpop.f32.mrf.mxu1 }
 0x1cc   :  { %v407_v17 = vmax.f32 %v402_v14, 0.0  ;;  %v408_v20 = vpack.c.bf16 %v406_v15, %v406_v15 }
 0x1cd   :  { %v404_v18 = vpop.f32.mrf.mxu1 }
 0x1ce   :  { %v409_v19 = vpack.c.bf16 %v407_v17, %v407_v17 }
 0x1d0   :  { %578 = vmatprep.mubr.bf16.mxu0 %v409_v19 }
 0x1d1   :  { %579 = vmatmul.mubr.bf16.vlgmr.msra.gmra.mxu0 %v408_v20 }
 0x291   :  { %v684_v21 = vpop.f32.mrf.mxu0 }
 0x293   :  { %v685_v23 = vpop.f32.mrf.mxu0 }
 0x294   :  { %v686_v24 = vadd.f32 %v685_v23, %v684_v21 }
 0x295   :  { %v687_v25 = vpop.f32.mrf.mxu0 }
 0x296   :  { %v581_v26 = vadd.f32 %v686_v24, %v650_v22 }
 0x297   :  { %v688_v27 = vpop.f32.mrf.mxu0 }
 0x298   :  { %768 = vtanh.f32 %v581_v26 }
 0x2a5   :  { %v769_v29 = vpop.eup %768 }
 0x2a6   :  { %v596_v30 = vmul.f32 %v769_v29, %v594_v28 }
 0x2a8   :  { %597 = vst [vmem:[#allocation11] sm:$0xff] %v596_v30 }
 0x2a9   :  { %861 = shalt.err (!%p858_p10)
}
 0x2aa   :  { %607 = dma.vmem_to_hbm [thread:$0]  %s605_s9, 128, %s968_s8, [#allocation5]  }
 0x2ab   :  { %876 = dma.done.wait [#allocation5], 128  }
 0x2ac   :  { %877 = vsyncadd [#allocation5], 4294967168 }
 0x2ad   :  { %611 = vsyncpa [#allocation4], 1 }
 0x2ae   :  { %612 = vsyncpa [#allocation7], 1 }
 0x2af   :  { %613 = vsyncpa [#allocation10], 1 }
 0x2b0   :  { %614 = vsyncpa [#allocation5], 1 }

// kernel: fwd.1
= control target key start
LH: loop header
LB: loop body
LE: loop exit
PB: predicated region body
PF: predicated region fallthrough
CT: control target
= control target key end

     0   :  { %s960_s0 = inlined_call_operand.<no memory space> [shape: f32[1,1], index: 0, kind: input, shape index: {}]   ;;  %s961_s1 = inlined_call_operand.hbm [shape: f32[8,16], index: 1, kind: input, shape index: {}]   ;;  %s962_s2 = inlined_call_operand.hbm [shape: bf16[16,256], index: 2, kind: input, shape index: {}]   ;;  %s963_s3 = inlined_call_operand.vmem [shape: f32[1,256], index: 3, kind: input, shape index: {}]   ;;  %s964_s4 = inlined_call_operand.hbm [shape: bf16[256,256], index: 4, kind: input, shape index: {}]   ;;  %s965_s5 = inlined_call_operand.vmem [shape: f32[1,256], index: 5, kind: input, shape index: {}]   ;;  %s966_s6 = inlined_call_operand.hbm [shape: bf16[256,128], index: 6, kind: input, shape index: {}]   ;;  %s967_s7 = inlined_call_operand.vmem [shape: f32[1,128], index: 7, kind: input, shape index: {}]   ;;  %s968_s8 = inlined_call_operand.hbm [shape: f32[8,128], index: 8, kind: output, shape index: {}]  }
   0x1   :  { %v13_v0 = vstv %s960_s0 }
   0x2   :  { %14 = vst [vmem:[#allocation2] sm:$0x1] %v13_v0 }
   0x3   :  { %15 = vsyncpa [#allocation4], 0 }
   0x4   :  { %16 = vsyncpa [#allocation7], 0 }
   0x5   :  { %17 = vsyncpa [#allocation10], 0 }
   0x6   :  { %18 = vsyncpa [#allocation5], 0  ;;  %s878_s29 = smov [#allocation6]  }
   0x7   :  { %s36_s30 = sshll.u32 %s878_s29, 4  ;;  %s37_s30 = int_to_ptr.vmem [resolvable:$true] %s36_s30 }
   0x8   :  { %s778_s9 = scalar_lea.vmem %s37_s30, 256  ;;  %p783_p1 = scmp.lt.s32.totalorder %s37_s30, %s37_s30 }
   0x9   :  { %p779_p0 = scmp.ne.s32.totalorder %s37_s30, %s778_s9  ;;  %p784_p2 = scmp.lt.s32.totalorder %s778_s9, %s778_s9 }
   0xb   :  { %p785_p3 = por %p784_p2, %p783_p1 }
   0xd   :  { %p786_p4 = pnand %p785_p3, %p779_p0 }
   0xf   :  { %789 = shalt.err (!%p786_p4)
}
  0x10   :  { %s879_s10 = smov 128   ;;  %s880_s11 = smov 8  }
  0x11   :  { %42 = dma.hbm_to_vmem [thread:$0]  %s962_s2, 256, %s37_s30, [#allocation7], %s879_s10, %s879_s10, %s880_s11  }
  0x12   :  { %s881_s0 = smov [#allocation3]   ;;  %s882_s15 = smov [#allocation8]  }
  0x13   :  { %s27_s14 = sshll.u32 %s881_s0, 4  ;;  %s50_s16 = sshll.u32 %s882_s15, 4  ;;  %s28_s14 = int_to_ptr.vmem [resolvable:$true] %s27_s14  ;;  %s51_s16 = int_to_ptr.vmem [resolvable:$true] %s50_s16 }
  0x14   :  { %s798_s17 = scalar_lea.vmem %s28_s14, 128  ;;  %p803_p6 = scmp.lt.s32.totalorder %s28_s14, %s28_s14 }
  0x15   :  { %p799_p5 = scmp.ne.s32.totalorder %s28_s14, %s798_s17  ;;  %p804_p7 = scmp.lt.s32.totalorder %s798_s17, %s798_s17 }
  0x17   :  { %p805_p8 = por %p804_p7, %p803_p6 }
  0x19   :  { %p806_p9 = pnand %p805_p8, %p799_p5 }
  0x1b   :  { %809 = shalt.err (!%p806_p9)
}
  0x1c   :  { %30 = dma.hbm_to_vmem [thread:$0]  %s961_s1, 128, %s28_s14, [#allocation4]  }
  0x1d   :  { %s818_s20 = scalar_lea.vmem %s51_s16, 4096  ;;  %p823_p11 = scmp.lt.s32.totalorder %s51_s16, %s51_s16 }
  0x1e   :  { %p819_p10 = scmp.ne.s32.totalorder %s51_s16, %s818_s20  ;;  %p824_p12 = scmp.lt.s32.totalorder %s818_s20, %s818_s20 }
  0x20   :  { %p825_p13 = por %p824_p12, %p823_p11 }
  0x22   :  { %p826_p0 = pnand %p825_p13, %p819_p10 }
  0x24   :  { %829 = shalt.err (!%p826_p0)
}
  0x25   :  { %56 = dma.hbm_to_vmem [thread:$0]  %s964_s4, 4096, %s51_s16, [#allocation7], %s879_s10, %s879_s10, %s880_s11  }
  0x26   :  { %s883_s22 = smov [#allocation9]  }
  0x27   :  { %s64_s23 = sshll.u32 %s883_s22, 4  ;;  %s65_s23 = int_to_ptr.vmem [resolvable:$true] %s64_s23 }
  0x28   :  { %s838_s24 = scalar_lea.vmem %s65_s23, 2048  ;;  %p843_p2 = scmp.lt.s32.totalorder %s65_s23, %s65_s23 }
  0x29   :  { %p839_p1 = scmp.ne.s32.totalorder %s65_s23, %s838_s24  ;;  %p844_p3 = scmp.lt.s32.totalorder %s838_s24, %s838_s24 }
  0x2b   :  { %p845_p4 = por %p844_p3, %p843_p2 }
  0x2d   :  { %p846_p5 = pnand %p845_p4, %p839_p1 }
  0x2f   :  { %849 = shalt.err (!%p846_p5)
}
  0x30   :  { %s884_s1 = smov 64   ;;  %s885_s25 = smov 4  }
  0x31   :  { %70 = dma.hbm_to_vmem [thread:$0]  %s966_s6, 2048, %s65_s23, [#allocation10], %s884_s1, %s884_s1, %s885_s25  }
  0x32   :  { %870 = dma.done.wait [#allocation4], 128  }
  0x33   :  { %871 = vsyncadd [#allocation4], 4294967168 }
  0x34   :  { %872 = dma.done.wait [#allocation7], 4352  }
  0x35   :  { %873 = vsyncadd [#allocation7], 4294962944 }
  0x36   :  { %874 = dma.done.wait [#allocation10], 2048  }
  0x37   :  { %875 = vsyncadd [#allocation10], 4294965248  ;;  %v886_v1 = vmov 0   ;;  %v701_v2 = vld [vmem:[#allocation6 + $0x4] ss:$8 sps:$4 sm:$0xff]   ;;  %v86_v4 = vld [vmem:[#allocation3] sm:$0xff]  ;;  %v92_v50 = vlaneseq }
  0x38   :  { %148 = vmatprep.mubr.bf16.mxu0 %v886_v1  ;;  %700 = vset.pattern.permute.xlu0 %v886_v1  ;;  %v703_v3 = vld [vmem:[#allocation6] ss:$8 sps:$4 sm:$0xff]   ;;  %v87_v5 = vpack.c.bf16 %v86_v4, %v86_v4  ;;  %v704_v6 = vld [vmem:[#allocation8 + $0x74] ss:$8 sps:$4 sm:$0xff]   ;;  %vm112_vm0 = vcmask 130048   ;;  %v756_v42 = vld [vmem:[#allocation9 + $0x68] sm:$0xff]  }
  0x39   :  { %130 = vmatprep.subr.bf16.mxu0 %v701_v2  ;;  %v706_v7 = vld [vmem:[#allocation8 + $0x70] ss:$8 sps:$4 sm:$0xff]   ;;  %v707_v8 = vld [vmem:[#allocation8 + $0x64] ss:$8 sps:$4 sm:$0xff]   ;;  %365 = vmatprep.subr.bf16.mxu1 %v704_v6  ;;  %v709_v9 = vld [vmem:[#allocation8 + $0x60] ss:$8 sps:$4 sm:$0xff]  }
  0x3a   :  { %131 = vmatpush1.bf16.msra.mxu0 %v703_v3  ;;  %366 = vmatpush1.bf16.msra.mxu1 %v706_v7  ;;  %v710_v10 = vld [vmem:[#allocation8 + $0x54] ss:$8 sps:$4 sm:$0xff]   ;;  %v712_v11 = vld [vmem:[#allocation8 + $0x50] ss:$8 sps:$4 sm:$0xff]   ;;  %v713_v12 = vld [vmem:[#allocation8 + $0x44] ss:$8 sps:$4 sm:$0xff]  }
  0x3b   :  { %367 = vmatprep.subr.bf16.mxu1 %v707_v8  ;;  %v715_v13 = vld [vmem:[#allocation8 + $0x40] ss:$8 sps:$4 sm:$0xff]   ;;  %v716_v14 = vld [vmem:[#allocation8 + $0x34] ss:$8 sps:$4 sm:$0xff]   ;;  %v718_v15 = vld [vmem:[#allocation8 + $0x30] ss:$8 sps:$4 sm:$0xff]  }
  0x3c   :  { %v719_v16 = vld [vmem:[#allocation8 + $0x24] ss:$8 sps:$4 sm:$0xff]   ;;  %v721_v17 = vld [vmem:[#allocation8 + $0x20] ss:$8 sps:$4 sm:$0xff]   ;;  %v722_v18 = vld [vmem:[#allocation8 + $0x14] ss:$8 sps:$4 sm:$0xff]  }
  0x3d   :  { %617 = vmatmul.mubr.msk.bf16.vlgmr.msra.gmra.mxu0 %vm112_vm0, %v87_v5  ;;  %v724_v19 = vld [vmem:[#allocation8 + $0x10] ss:$8 sps:$4 sm:$0xff]   ;;  %v725_v20 = vld [vmem:[#allocation8 + $0x4] ss:$8 sps:$4 sm:$0xff]   ;;  %v727_v21 = vld [vmem:[#allocation8] ss:$8 sps:$4 sm:$0xff]  }
  0x3e   :  { %368 = vmatpush1.bf16.msra.mxu1 %v709_v9  ;;  %v728_v22 = vld [vmem:[#allocation8 + $0xf4] ss:$8 sps:$4 sm:$0xff]   ;;  %v730_v23 = vld [vmem:[#allocation8 + $0xf0] ss:$8 sps:$4 sm:$0xff]   ;;  %v731_v24 = vld [vmem:[#allocation8 + $0xe4] ss:$8 sps:$4 sm:$0xff]  }
  0x3f   :  { %369 = vmatprep.subr.bf16.mxu1 %v710_v10  ;;  %v733_v25 = vld [vmem:[#allocation8 + $0xe0] ss:$8 sps:$4 sm:$0xff]   ;;  %v734_v26 = vld [vmem:[#allocation8 + $0xd4] ss:$8 sps:$4 sm:$0xff]   ;;  %v736_v27 = vld [vmem:[#allocation8 + $0xd0] ss:$8 sps:$4 sm:$0xff]  }
  0x40   :  { %v737_v28 = vld [vmem:[#allocation8 + $0xc4] ss:$8 sps:$4 sm:$0xff]   ;;  %v739_v29 = vld [vmem:[#allocation8 + $0xc0] ss:$8 sps:$4 sm:$0xff]   ;;  %v740_v30 = vld [vmem:[#allocation8 + $0xb4] ss:$8 sps:$4 sm:$0xff]  }
  0x41   :  { %v742_v31 = vld [vmem:[#allocation8 + $0xb0] ss:$8 sps:$4 sm:$0xff]   ;;  %v743_v32 = vld [vmem:[#allocation8 + $0xa4] ss:$8 sps:$4 sm:$0xff]   ;;  %v745_v33 = vld [vmem:[#allocation8 + $0xa0] ss:$8 sps:$4 sm:$0xff]  }
  0x42   :  { %370 = vmatpush1.bf16.msra.mxu1 %v712_v11  ;;  %v746_v34 = vld [vmem:[#allocation8 + $0x94] ss:$8 sps:$4 sm:$0xff]   ;;  %v748_v35 = vld [vmem:[#allocation8 + $0x90] ss:$8 sps:$4 sm:$0xff]   ;;  %v749_v36 = vld [vmem:[#allocation8 + $0x84] ss:$8 sps:$4 sm:$0xff]  }
  0x43   :  { %371 = vmatprep.subr.bf16.mxu1 %v713_v12  ;;  %v751_v37 = vld [vmem:[#allocation8 + $0x80] ss:$8 sps:$4 sm:$0xff]   ;;  %v752_v38 = vld [vmem:[#allocation9 + $0x78] sm:$0xff]   ;;  %v754_v40 = vld [vmem:[#allocation9 + $0x70] sm:$0xff]   ;;  %v93_v51 = vshrl.u32 %v92_v50, 7 }
  0x44   :  { %v753_v39 = vld [vmem:[#allocation9 + $0x38] sm:$0xff]   ;;  %668 = vmatprep.subr.bf16.mxu0 %v752_v38  ;;  %v755_v41 = vld [vmem:[#allocation9 + $0x30] sm:$0xff]   ;;  %v757_v43 = vld [vmem:[#allocation9 + $0x28] sm:$0xff]  }
  0x45   :  { %669 = vmatpush3.bf16.msra.mxu0 %v753_v39  ;;  %v758_v44 = vld [vmem:[#allocation9 + $0x60] sm:$0xff]   ;;  %v760_v46 = vld [vmem:[#allocation9 + $0x58] sm:$0xff]   ;;  %v762_v48 = vld [vmem:[#allocation9 + $0x50] sm:$0xff]   ;;  %v94_v52 = vsub.s32 0, %v93_v51  ;;  %v98_v54 = vsub.s32 1, %v93_v51 }
  0x46   :  { %372 = vmatpush1.bf16.msra.mxu1 %v715_v13  ;;  %670 = vmatprep.subr.bf16.mxu0 %v754_v40  ;;  %v759_v45 = vld [vmem:[#allocation9 + $0x20] sm:$0xff]   ;;  %v761_v47 = vld [vmem:[#allocation9 + $0x18] sm:$0xff]   ;;  %v763_v49 = vld [vmem:[#allocation9 + $0x10] sm:$0xff]  }
  0x47   :  { %373 = vmatprep.subr.bf16.mxu1 %v716_v14  ;;  %v90_v53 = vld [vmem:[%s963_s3] sm:$0x3] }
  0x48   :  { %v95_v55 = vrot.slane %v90_v53, %v94_v52  ;;  %v99_v56 = vrot.slane %v90_v53, %v98_v54  ;;  %v764_v3 = vld [vmem:[#allocation9 + $0x48] sm:$0xff]   ;;  %v766_v5 = vld [vmem:[#allocation9 + $0x40] sm:$0xff]  }
  0x49   :  { %671 = vmatpush3.bf16.msra.mxu0 %v755_v41  ;;  %v765_v4 = vld [vmem:[#allocation9 + $0x8] sm:$0xff]   ;;  %v767_v6 = vld [vmem:[#allocation9] sm:$0xff]  }
  0x4a   :  { %374 = vmatpush1.bf16.msra.mxu1 %v718_v15  ;;  %672 = vmatprep.subr.bf16.mxu0 %v756_v42  ;;  %v667_v7 = vld [vmem:[#allocation2] ss:$0 sm:$0xff] }
  0x4b   :  { %375 = vmatprep.subr.bf16.mxu1 %v719_v16  ;;  %593 = vperm.xlu0 %700, %v667_v7   ;;  %v193_v8 = vld [vmem:[%s965_s5] sm:$0x3]  ;;  %s887_s5 = smov [#allocation11]  }
  0x4c   :  { %v198_v9 = vrot.slane %v193_v8, %v94_v52  ;;  %v202_v10 = vrot.slane %v193_v8, %v98_v54  ;;  %s604_s9 = sshll.u32 %s887_s5, 4  ;;  %s605_s9 = int_to_ptr.vmem [resolvable:$true] %s604_s9 }
  0x4d   :  { %673 = vmatpush3.bf16.msra.mxu0 %v757_v43  ;;  %s850_s10 = scalar_lea.vmem %s605_s9, 128  ;;  %p855_p7 = scmp.lt.s32.totalorder %s605_s9, %s605_s9 }
  0x4e   :  { %376 = vmatpush1.bf16.msra.mxu1 %v721_v17  ;;  %674 = vmatprep.subr.bf16.mxu0 %v758_v44  ;;  %p851_p6 = scmp.ne.s32.totalorder %s605_s9, %s850_s10  ;;  %p856_p8 = scmp.lt.s32.totalorder %s850_s10, %s850_s10 }
  0x4f   :  { %377 = vmatprep.subr.bf16.mxu1 %v722_v18 }
  0x50   :  { %p857_p9 = por %p856_p8, %p855_p7 }
  0x51   :  { %675 = vmatpush3.bf16.msra.mxu0 %v759_v45 }
  0x52   :  { %378 = vmatpush1.bf16.msra.mxu1 %v724_v19  ;;  %676 = vmatprep.subr.bf16.mxu0 %v760_v46  ;;  %p858_p10 = pnand %p857_p9, %p851_p6 }
  0x53   :  { %379 = vmatprep.subr.bf16.mxu1 %v725_v20 }
  0x55   :  { %677 = vmatpush3.bf16.msra.mxu0 %v761_v47 }
  0x56   :  { %380 = vmatpush1.bf16.msra.mxu1 %v727_v21  ;;  %678 = vmatprep.subr.bf16.mxu0 %v762_v48 }
  0x57   :  { %381 = vmatprep.subr.bf16.mxu1 %v728_v22  ;;  %v650_v22 = vld [vmem:[%s967_s7] ss:$0 sm:$0xff] }
  0x59   :  { %679 = vmatpush3.bf16.msra.mxu0 %v763_v49 }
  0x5a   :  { %382 = vmatpush2.bf16.msra.mxu1 %v730_v23  ;;  %680 = vmatprep.subr.bf16.mxu0 %v764_v3 }
  0x5b   :  { %383 = vmatprep.subr.bf16.mxu1 %v731_v24 }
  0x5d   :  { %681 = vmatpush3.bf16.msra.mxu0 %v765_v4 }
  0x5e   :  { %384 = vmatpush2.bf16.msra.mxu1 %v733_v25  ;;  %682 = vmatprep.subr.bf16.mxu0 %v766_v5 }
  0x5f   :  { %385 = vmatprep.subr.bf16.mxu1 %v734_v26 }
  0x61   :  { %683 = vmatpush3.bf16.msra.mxu0 %v767_v6 }
  0x62   :  { %386 = vmatpush2.bf16.msra.mxu1 %v736_v27 }
  0x63   :  { %387 = vmatprep.subr.bf16.mxu1 %v737_v28 }
  0x66   :  { %388 = vmatpush2.bf16.msra.mxu1 %v739_v29 }
  0x67   :  { %389 = vmatprep.subr.bf16.mxu1 %v740_v30 }
  0x6a   :  { %390 = vmatpush2.bf16.msra.mxu1 %v742_v31 }
  0x6b   :  { %391 = vmatprep.subr.bf16.mxu1 %v743_v32 }
  0x6e   :  { %392 = vmatpush2.bf16.msra.mxu1 %v745_v33 }
  0x6f   :  { %393 = vmatprep.subr.bf16.mxu1 %v746_v34 }
  0x72   :  { %394 = vmatpush2.bf16.msra.mxu1 %v748_v35 }
  0x73   :  { %395 = vmatprep.subr.bf16.mxu1 %v749_v36 }
  0x76   :  { %396 = vmatpush2.bf16.msra.mxu1 %v751_v37 }
  0xc6   :  { %v594_v28 = vpop.permute.xlu0 %593 }
  0xfd   :  { %v150_v57 = vpop.f32.mrf.mxu0 }
  0xfe   :  { %v151_v58 = vadd.f32 %v150_v57, %v95_v55 }
  0xff   :  { %v152_v59 = vpop.f32.mrf.mxu0 }
 0x100   :  { %v153_v60 = vadd.f32 %v152_v59, %v99_v56  ;;  %v157_v61 = vmax.f32 %v151_v58, 0.0 }
 0x101   :  { %v154_v62 = vpop.f32.mrf.mxu0 }
 0x102   :  { %v158_v63 = vmax.f32 %v153_v60, 0.0  ;;  %v159_v2 = vpack.c.bf16 %v157_v61, %v157_v61 }
 0x103   :  { %v155_v0 = vpop.f32.mrf.mxu0 }
 0x104   :  { %v160_v1 = vpack.c.bf16 %v158_v63, %v158_v63 }
 0x106   :  { %397 = vmatprep.mubr.bf16.mxu1 %v160_v1 }
 0x107   :  { %398 = vmatmul.mubr.bf16.vlgmr.msra.gmra.mxu1 %v159_v2 }
 0x1c7   :  { %v399_v11 = vpop.f32.mrf.mxu1 }
 0x1c8   :  { %v400_v12 = vadd.f32 %v399_v11, %v198_v9 }
 0x1c9   :  { %v401_v13 = vpop.f32.mrf.mxu1 }
 0x1ca   :  { %v402_v14 = vadd.f32 %v401_v13, %v202_v10  ;;  %v406_v15 = vmax.f32 %v400_v12, 0.0 }
 0x1cb   :  { %v403_v16 = vpop.f32.mrf.mxu1 }
 0x1cc   :  { %v407_v17 = vmax.f32 %v402_v14, 0.0  ;;  %v408_v20 = vpack.c.bf16 %v406_v15, %v406_v15 }
 0x1cd   :  { %v404_v18 = vpop.f32.mrf.mxu1 }
 0x1ce   :  { %v409_v19 = vpack.c.bf16 %v407_v17, %v407_v17 }
 0x1d0   :  { %578 = vmatprep.mubr.bf16.mxu0 %v409_v19 }
 0x1d1   :  { %579 = vmatmul.mubr.bf16.vlgmr.msra.gmra.mxu0 %v408_v20 }
 0x291   :  { %v684_v21 = vpop.f32.mrf.mxu0 }
 0x293   :  { %v685_v23 = vpop.f32.mrf.mxu0 }
 0x294   :  { %v686_v24 = vadd.f32 %v685_v23, %v684_v21 }
 0x295   :  { %v687_v25 = vpop.f32.mrf.mxu0 }
 0x296   :  { %v581_v26 = vadd.f32 %v686_v24, %v650_v22 }
 0x297   :  { %v688_v27 = vpop.f32.mrf.mxu0 }
 0x298   :  { %768 = vtanh.f32 %v581_v26 }
 0x2a5   :  { %v769_v29 = vpop.eup %768 }
 0x2a6   :  { %v596_v30 = vmul.f32 %v769_v29, %v594_v28 }
 0x2a8   :  { %597 = vst [vmem:[#allocation11] sm:$0xff] %v596_v30 }
 0x2a9   :  { %861 = shalt.err (!%p858_p10)
}
 0x2aa   :  { %607 = dma.vmem_to_hbm [thread:$0]  %s605_s9, 128, %s968_s8, [#allocation5]  }
 0x2ab   :  { %876 = dma.done.wait [#allocation5], 128  }
 0x2ac   :  { %877 = vsyncadd [#allocation5], 4294967168 }
 0x2ad   :  { %611 = vsyncpa [#allocation4], 1 }
 0x2ae   :  { %612 = vsyncpa [#allocation7], 1 }
 0x2af   :  { %613 = vsyncpa [#allocation10], 1 }
 0x2b0   :  { %614 = vsyncpa [#allocation5], 1 }

</bundles_post_ra>
